<compile_context>
chip_gen: v5e
topology: v5e:2x2
jax: 0.10.0
libtpu: 0.0.40
codegen_flags: <defaults>
</compile_context>

<pallas_src>
import math

import jax
import jax.numpy as jnp
from jax.experimental import pallas as pl
from jax.experimental.pallas import tpu as pltpu


def gcn_kernel(adj_ref, x_ref, w_ref, b_ref, out_ref):
    """One graph per grid step.

    adj_ref: (1, N, N) f32      x_ref: (1, N, F_in_p) f32 (lane-padded)
    w_ref:   (F_in_p, F_out_p)  b_ref: (1, F_out_p)
    out_ref: (1, N, F_out_p)
    """
    f32 = jnp.float32
    adj = adj_ref[0]                                   # (N, N)
    n = adj.shape[0]

    row = jax.lax.broadcasted_iota(jnp.int32, (n, n), 0)
    col = jax.lax.broadcasted_iota(jnp.int32, (n, n), 1)
    diag_mask = row == col

    # adj_norm = adj + I   (VPU select; no separate eye temporary)
    adj_norm = jnp.where(diag_mask, adj + 1.0, adj)

    # deg = diag(adj_norm.sum(1)).pow(-0.5)  -- bug-for-bug: off-diagonal entries
    # are 0**-0.5 == +inf.  rsqrt(row_sum) on the (N,1) vector (N EUP ops, free
    # EUP slot) + constant inf off the diagonal gives identical IEEE values.
    row_sum = jnp.sum(adj_norm, axis=1, keepdims=True)           # (N, 1)
    deg = jnp.where(diag_mask, jax.lax.rsqrt(row_sum),
                    jnp.asarray(jnp.inf, f32))                   # (N, N)

    # adj_norm = deg @ adj_norm @ deg  (kept dense to preserve the reference's
    # inf/NaN propagation; MXU matmuls, f32 accumulation)
    adj_norm = jnp.dot(deg, adj_norm, preferred_element_type=f32)
    adj_norm = jnp.dot(adj_norm, deg, preferred_element_type=f32)

    # linear(adj_norm @ x).  F_out >= F_in here, so (adj_norm @ x) @ W minimizes
    # MACs; for F_out < F_in the order adj_norm @ (x @ W) would be cheaper.
    h = jnp.dot(adj_norm, x_ref[0], preferred_element_type=f32)  # (N, F_in_p)
    out = jnp.dot(h, w_ref[...], preferred_element_type=f32) + b_ref[...]
    out_ref[0] = out.astype(out_ref.dtype)


def _round_up_to_lanes(v):
    return pl.cdiv(v, 128) * 128


def gcn_layer(adj, x, weight, bias):
    """GCNLayer forward.

    adj:    (N, N) or (B, N, N)
    x:      (N, F_in) or (B, N, F_in)
    weight: (F_out, F_in)   -- PyTorch nn.Linear layout
    bias:   (F_out,)
    returns (N, F_out) or (B, N, F_out)
    """
    squeeze = adj.ndim == 2
    if squeeze:
        adj, x = adj[None], x[None]
    adj = adj.astype(jnp.float32)
    x = x.astype(jnp.float32)

    b, n, f_in = x.shape
    f_out = weight.shape[0]

    # Lane-dense padding of the feature dims (zero padding leaves the math
    # unchanged; padded output columns are sliced off below).
    f_in_p = _round_up_to_lanes(f_in)
    f_out_p = _round_up_to_lanes(f_out)
    x_p = jnp.zeros((b, n, f_in_p), jnp.float32).at[:, :, :f_in].set(x)
    w_p = jnp.zeros((f_in_p, f_out_p), jnp.float32).at[:f_in, :f_out].set(
        weight.T.astype(jnp.float32))
    b_p = jnp.zeros((1, f_out_p), jnp.float32).at[0, :f_out].set(
        bias.astype(jnp.float32))

    out = pl.pallas_call(
        gcn_kernel,
        out_shape=jax.ShapeDtypeStruct((b, n, f_out_p), jnp.float32),
        grid_spec=pltpu.PrefetchScalarGridSpec(
            num_scalar_prefetch=0,
            grid=(b,),                                  # one graph per grid step
            in_specs=[
                pl.BlockSpec((1, n, n), lambda g: (g, 0, 0)),        # adj
                pl.BlockSpec((1, n, f_in_p), lambda g: (g, 0, 0)),   # x (padded)
                pl.BlockSpec((f_in_p, f_out_p), lambda g: (0, 0)),   # W^T (resident)
                pl.BlockSpec((1, f_out_p), lambda g: (0, 0)),        # bias (resident)
            ],
            out_specs=pl.BlockSpec((1, n, f_out_p), lambda g: (g, 0, 0)),
        ),
        compiler_params=pltpu.CompilerParams(
            # batch axis is independent -> shards across v7x's 2 TensorCores,
            # harmless on v5e/v6e.
            dimension_semantics=("parallel",)),
    )(adj, x_p, w_p, b_p)

    out = out[:, :, :f_out]
    return out[0] if squeeze else out


if __name__ == "__main__":
    B = 8             # batch of graphs (amortizes launch/DMA, feeds the pipeline)
    N = 32            # nodes per graph
    IN_FEATURES = 16
    OUT_FEATURES = 32

    key = jax.random.PRNGKey(0)
    k_adj, k_x, k_w, k_b = jax.random.split(key, 4)

    adj = jax.random.uniform(k_adj, (B, N, N), dtype=jnp.float32)
    x = jax.random.normal(k_x, (B, N, IN_FEATURES), dtype=jnp.float32)

    # nn.Linear-style init: U(-1/sqrt(fan_in), 1/sqrt(fan_in)); PyTorch layout.
    bound = 1.0 / math.sqrt(IN_FEATURES)
    weight = jax.random.uniform(k_w, (OUT_FEATURES, IN_FEATURES),
                                dtype=jnp.float32, minval=-bound, maxval=bound)
    bias = jax.random.uniform(k_b, (OUT_FEATURES,), dtype=jnp.float32,
                              minval=-bound, maxval=bound)

    # Batched path (grid over B graphs).
    out = gcn_layer(adj, x, weight, bias)
    jax.block_until_ready(out)
    assert out.shape == (B, N, OUT_FEATURES)

    # Single-graph path (matches the PyTorch module call signature).
    out1 = gcn_layer(adj[0], x[0], weight, bias)
    jax.block_until_ready(out1)
    assert out1.shape == (N, OUT_FEATURES)

    print("KERNEL_OK")
</pallas_src>

<mosaic_0001>
module attributes {stable_mosaic.version = 11 : i64} {
  func.func @gcn_kernel(%arg0: i32, %arg1: memref<1x32x32xf32, #tpu.memory_space<vmem>>, %arg2: memref<1x32x128xf32, #tpu.memory_space<vmem>>, %arg3: memref<128x128xf32, #tpu.memory_space<vmem>>, %arg4: memref<1x128xf32, #tpu.memory_space<vmem>>, %arg5: memref<1x32x128xf32, #tpu.memory_space<vmem>>) attributes {dimension_semantics = [#tpu.dimension_semantics<parallel>], iteration_bounds = array<i64: 8>, scalar_prefetch = 0 : i64, scratch_operands = 0 : i64, tpu.core_type = #tpu.core_type<tc>, window_params = [{transform_indices = @transform_0, window_bounds = array<i64: 1, 32, 32>}, {transform_indices = @transform_1, window_bounds = array<i64: 1, 32, 128>}, {pipeline_mode = #tpu.pipeline_mode<synchronous>, transform_indices = @transform_2, window_bounds = array<i64: 128, 128>}, {pipeline_mode = #tpu.pipeline_mode<synchronous>, transform_indices = @transform_3, window_bounds = array<i64: 1, 128>}, {transform_indices = @transform_4, window_bounds = array<i64: 1, 32, 128>}]} {
    %c0 = arith.constant 0 : index
    %c0_0 = arith.constant 0 : index
    %c0_1 = arith.constant 0 : index
    %0 = vector.load %arg1[%c0, %c0_0, %c0_1] : memref<1x32x32xf32, #tpu.memory_space<vmem>>, vector<1x32x32xf32>
    %1 = vector.shape_cast %0 : vector<1x32x32xf32> to vector<32x32xf32>
    %2 = tpu.iota {dimensions = array<i32: 0>} : vector<32x32xi32>
    %3 = tpu.iota {dimensions = array<i32: 1>} : vector<32x32xi32>
    %4 = arith.cmpi eq, %2, %3 : vector<32x32xi32>
    %cst = arith.constant 1.000000e+00 : f32
    %5 = vector.broadcast %cst : f32 to vector<32x32xf32>
    %6 = arith.addf %1, %5 : vector<32x32xf32>
    %7 = arith.select %4, %6, %1 : vector<32x32xi1>, vector<32x32xf32>
    %cst_2 = arith.constant dense<0.000000e+00> : vector<32xf32>
    %8 = vector.multi_reduction <add>, %7, %cst_2 [1] : vector<32x32xf32> to vector<32xf32>
    %9 = vector.shape_cast %8 : vector<32xf32> to vector<32x1xf32>
    %10 = math.rsqrt %9 : vector<32x1xf32>
    %cst_3 = arith.constant 0x7F800000 : f32
    %11 = vector.shape_cast %10 : vector<32x1xf32> to vector<32x1xf32>
    %12 = vector.broadcast %11 : vector<32x1xf32> to vector<32x32xf32>
    %13 = vector.broadcast %cst_3 : f32 to vector<32x32xf32>
    %14 = arith.select %4, %12, %13 : vector<32x32xi1>, vector<32x32xf32>
    %cst_4 = arith.constant dense<0.000000e+00> : vector<32x32xf32>
    %15 = tpu.matmul %14, %7, %cst_4 {dimension_numbers = #tpu.dot_dimension_numbers<[1], [0], [0], [1], [0, 0, 1, 1], [], []>} : vector<32x32xf32>, vector<32x32xf32>, vector<32x32xf32> -> vector<32x32xf32>
    %cst_5 = arith.constant dense<0.000000e+00> : vector<32x32xf32>
    %16 = tpu.matmul %15, %14, %cst_5 {dimension_numbers = #tpu.dot_dimension_numbers<[1], [0], [0], [1], [0, 0, 1, 1], [], []>} : vector<32x32xf32>, vector<32x32xf32>, vector<32x32xf32> -> vector<32x32xf32>
    %c0_6 = arith.constant 0 : index
    %c0_7 = arith.constant 0 : index
    %c0_8 = arith.constant 0 : index
    %17 = vector.load %arg2[%c0_6, %c0_7, %c0_8] : memref<1x32x128xf32, #tpu.memory_space<vmem>>, vector<1x32x128xf32>
    %18 = vector.shape_cast %17 : vector<1x32x128xf32> to vector<32x128xf32>
    %cst_9 = arith.constant dense<0.000000e+00> : vector<32x128xf32>
    %19 = tpu.matmul %16, %18, %cst_9 {dimension_numbers = #tpu.dot_dimension_numbers<[1], [0], [0], [1], [0, 0, 1, 1], [], []>} : vector<32x32xf32>, vector<32x128xf32>, vector<32x128xf32> -> vector<32x128xf32>
    %c0_10 = arith.constant 0 : index
    %c0_11 = arith.constant 0 : index
    %20 = vector.load %arg3[%c0_10, %c0_11] : memref<128x128xf32, #tpu.memory_space<vmem>>, vector<128x128xf32>
    %cst_12 = arith.constant dense<0.000000e+00> : vector<32x128xf32>
    %21 = tpu.matmul %19, %20, %cst_12 {dimension_numbers = #tpu.dot_dimension_numbers<[1], [0], [0], [1], [0, 0, 1, 1], [], []>} : vector<32x128xf32>, vector<128x128xf32>, vector<32x128xf32> -> vector<32x128xf32>
    %c0_13 = arith.constant 0 : index
    %c0_14 = arith.constant 0 : index
    %22 = vector.load %arg4[%c0_13, %c0_14] : memref<1x128xf32, #tpu.memory_space<vmem>>, vector<1x128xf32>
    %23 = vector.broadcast %22 : vector<1x128xf32> to vector<32x128xf32>
    %24 = arith.addf %21, %23 : vector<32x128xf32>
    %c0_15 = arith.constant 0 : index
    %c0_16 = arith.constant 0 : index
    %c0_17 = arith.constant 0 : index
    %25 = vector.load %arg5[%c0_15, %c0_16, %c0_17] : memref<1x32x128xf32, #tpu.memory_space<vmem>>, vector<1x32x128xf32>
    %26 = vector.shape_cast %25 : vector<1x32x128xf32> to vector<32x128xf32>
    %27 = vector.shape_cast %24 : vector<32x128xf32> to vector<1x32x128xf32>
    tpu.vector_store %arg5[%c0_15, %c0_16, %c0_17], %27 {strides = array<i32>} : memref<1x32x128xf32, #tpu.memory_space<vmem>>, vector<1x32x128xf32>,
    return
  }
  func.func @transform_0(%arg0: i32) -> (i32, i32, i32) {
    %c0_i32 = arith.constant 0 : i32
    %c0_i32_0 = arith.constant 0 : i32
    %c0_i32_1 = arith.constant 0 : i32
    return %arg0, %c0_i32, %c0_i32_0 : i32, i32, i32
  }
  func.func @transform_1(%arg0: i32) -> (i32, i32, i32) {
    %c0_i32 = arith.constant 0 : i32
    %c0_i32_0 = arith.constant 0 : i32
    %c0_i32_1 = arith.constant 0 : i32
    return %arg0, %c0_i32, %c0_i32_0 : i32, i32, i32
  }
  func.func @transform_2(%arg0: i32) -> (i32, i32) {
    %c0_i32 = arith.constant 0 : i32
    %c0_i32_0 = arith.constant 0 : i32
    %c0_i32_1 = arith.constant 0 : i32
    return %c0_i32, %c0_i32_0 : i32, i32
  }
  func.func @transform_3(%arg0: i32) -> (i32, i32) {
    %c0_i32 = arith.constant 0 : i32
    %c0_i32_0 = arith.constant 0 : i32
    %c0_i32_1 = arith.constant 0 : i32
    return %c0_i32, %c0_i32_0 : i32, i32
  }
  func.func @transform_4(%arg0: i32) -> (i32, i32, i32) {
    %c0_i32 = arith.constant 0 : i32
    %c0_i32_0 = arith.constant 0 : i32
    %c0_i32_1 = arith.constant 0 : i32
    return %arg0, %c0_i32, %c0_i32_0 : i32, i32, i32
  }
}

</mosaic_0001>

<bundles_post_ra>
// kernel: tpu_custom_call.1
= control target key start
LH: loop header
LB: loop body
LE: loop exit
PB: predicated region body
PF: predicated region fallthrough
CT: control target
= control target key end

     0   :  { %s1249_s0 = inlined_call_operand.hbm [shape: f32[8,32,32], index: 0, kind: input, shape index: {}]   ;;  %s1250_s1 = inlined_call_operand.hbm [shape: f32[8,32,128], index: 1, kind: input, shape index: {}]   ;;  %s1251_s2 = inlined_call_operand.hbm [shape: f32[128,128], index: 2, kind: input, shape index: {}]   ;;  %s1252_s3 = inlined_call_operand.vmem [shape: f32[1,128], index: 3, kind: input, shape index: {}]   ;;  %s1253_s4 = inlined_call_operand.hbm [shape: f32[8,32,128], index: 4, kind: output, shape index: {}]  }
   0x1   :  { %1258 = sst [smem:[#allocation13_spill]] %s1249_s0 }
   0x2   :  { %1259 = sst [smem:[#allocation14_spill]] %s1251_s2 }
   0x3   :  { %9 = vsyncpa [#allocation3], 0 }
   0x4   :  { %11 = vsyncpa [#allocation3 + $0x1], 0 }
   0x5   :  { %12 = vsyncpa [#allocation6], 0 }
   0x6   :  { %14 = vsyncpa [#allocation6 + $0x1], 0 }
   0x7   :  { %15 = vsyncpa [#allocation4], 0 }
   0x8   :  { %17 = vsyncpa [#allocation4 + $0x1], 0  ;;  %s995_s15 = smov 0   ;;  %s997_s16 = smov 0  }
   0x9   :  { %s999_s17 = smov 0   ;;  %s1001_s18 = smov 0  }
   0xa LB: > { %s1016_s19 = sadd.s32 4294967295, %s963_s18   ;;  %s657_s20 = sadd.s32 4294967294, %s963_s18   ;;  %s963_s18 = sphi %s1001_s18, %s1274_s18   ;;  %s959_s17 = sphi %s999_s17, %s1273_s17   ;;  %s955_s16 = sphi %s997_s16, %s1272_s16   ;;  %s951_s15 = sphi %s995_s15, %s1271_s15  }
   0xb   : > { %p43_p0 = scmp.ne.s32.totalorder %s955_s16, %s951_s15  ;;  %p44_p1 = scmp.eq.s32.totalorder %s1016_s19, 0 }
   0xc   : > { %p135_p2 = scmp.eq.s32.totalorder %s1016_s19, 7  ;;  %p141_p3 = scmp.eq.s32.totalorder %s657_s20, 7 }
   0xd   : > { %p1025_p4 = por %p44_p1, %p43_p0  ;;  %p658_p5 = scmp.ge.s32.totalorder %s963_s18, 1 }
   0xe   : > { %p1030_p6 = por %p141_p3, %p43_p0  ;;  %p148_p7 = scmp.lt.s32.totalorder %s963_s18, 9 }
   0xf   : > { %s1262_s2 = sld [smem:[#allocation14_spill]]  ;;  %s965_s27 = smov [#allocation7]  }
  0x10   : > { %p1038_p8 = pnand %p658_p5, %p148_p7  ;;  %s161_s28 = sshll.u32 %s965_s27, 4  ;;  %s162_s28 = int_to_ptr.vmem [resolvable:$true] %s161_s28 }
  0x11   : > { %s1047_s29 = sadd.s32 1, %s963_s18   ;;  %s1254_s30 = smov 128  }
  0x12   : > { %p734_p9 = pneg %p1038_p8  ;;  %s1256_s5 = smov 8  }
  0x13   : > { %s27_s6 = ssub.s32 %s963_s18, %s1047_s29  ;;  %s30_s7 = sadd.s32 1, %s959_s17 }
  0x14   : > { %p735_p10 = pnand %p734_p9, %p44_p1  ;;  %p28_p11 = scmp.eq.s32.totalorder %s27_s6, 0 }
  0x15   : > { %s159_s25 = sshll.u32 %s1262_s2, 4  ;;  %p37_p12 = scmp.ne.s32.totalorder %s959_s17, %s955_s16  ;;  %s160_s25 = int_to_ptr.hbm [resolvable:$true] %s159_s25 }
  0x16   : > { %737 = dma.hbm_to_vmem [thread:$0]  (!%p735_p10), %s160_s25, 2048, %s162_s28, [#allocation6], %s1254_s30, %s1254_s30, %s1256_s5  }
  0x17   : > { %p38_p13 = scmp.eq.s32.totalorder %s963_s18, 0  ;;  %p750_p0 = scmp.lt.s32.totalorder %s963_s18, 8 }
  0x18   : > { %s1060_s8 = scalar_select %p28_p11, %s959_s17, %s30_s7  }
  0x19   : > { %p39_p3 = por %p38_p13, %p37_p12  ;;  %p1064_p5 = por %p135_p2, %p37_p12 }
  0x1a   : > { %s178_s10 = sand.u32 1, %s959_s17   ;;  %s689_s11 = sshll.u32 %s963_s18, 5 }
  0x1b   : > { %s661_s12 = sshll.u32 %s178_s10, 5  ;;  %s1265_s0 = sld [smem:[#allocation13_spill]] }
  0x1c   : > { %s182_s24 = scalar_lea.vmem [#allocation2], %s661_s12  ;;  %p1075_p7 = pnand %p750_p0, %p39_p3 }
  0x1d   : > { %s190_s25 = sshll.u32 %s182_s24, 4  ;;  %s209_s7 = scalar_lea.hbm %s1250_s1, %s689_s11  ;;  %s191_s25 = int_to_ptr.vmem [resolvable:$true] %s190_s25 }
  0x1e   : > { %s204_s30 = scalar_lea.vmem [#allocation5], %s661_s12  ;;  %s210_s13 = sshll.u32 %s209_s7, 4  ;;  %s211_s13 = int_to_ptr.hbm [resolvable:$true] %s210_s13 }
  0x1f   : > { %s1082_s5 = sshll.u32 %s204_s30, 4  ;;  %s179_s14 = scalar_lea.sflag [#allocation3], %s178_s10  ;;  %s213_s5 = int_to_ptr.vmem [resolvable:$true] %s1082_s5 }
  0x20   : > { %p833_p9 = pneg %p1075_p7 }
  0x21   : > { %s187_s20 = scalar_lea.hbm %s1265_s0, %s689_s11  ;;  %s836_s6 = scalar_lea.hbm %s1265_s0, 256 }
  0x22   : > { %s188_s23 = sshll.u32 %s187_s20, 4  ;;  %s189_s23 = int_to_ptr.hbm [resolvable:$true] %s188_s23 }
  0x23   : > { %s829_s20 = sshra.s32 %s189_s23, 4  ;;  %s830_s20 = int_to_ptr.hbm [resolvable:$true] %s829_s20 }
  0x24   : > { %s831_s24 = scalar_lea.hbm %s830_s20, 32  ;;  %p837_p12 = scmp.lt.s32.totalorder %s830_s20, %s1265_s0 }
  0x25   : > { %p832_p2 = scmp.ne.s32.totalorder %s830_s20, %s831_s24  ;;  %p838_p13 = scmp.lt.s32.totalorder %s836_s6, %s831_s24 }
  0x27   : > { %p834_p10 = pnand %p833_p9, %p832_p2  ;;  %p839_p0 = por %p838_p13, %p837_p12 }
  0x29   : > { %p835_p11 = pneg %p834_p10 }
  0x2b   : > { %p840_p3 = pnand %p839_p0, %p835_p11 }
  0x2d   : > { %843 = shalt.err (!%p840_p3)
}
  0x2e   : > { %s1267_s30 = smov 8   ;;  %s1268_s10 = smov 128  }
  0x2f   : > { %741 = dma.hbm_to_vmem [thread:$0]  (!%p1075_p7), %s189_s23, 512, %s191_s25, %s179_s14, %s1268_s10, %s1268_s10, %s1267_s30  }
  0x30   : > { %s200_s2 = sand.u32 1, %s963_s18   ;;  %s859_s28 = sshra.s32 %s211_s13, 4  ;;  %s860_s28 = int_to_ptr.hbm [resolvable:$true] %s859_s28 }
  0x31   : > { %s201_s7 = scalar_lea.sflag [#allocation6], %s200_s2  ;;  %s861_s20 = scalar_lea.hbm %s860_s28, 32 }
  0x32   : > { %p862_p2 = scmp.ne.s32.totalorder %s860_s28, %s861_s20  ;;  %s866_s11 = scalar_lea.hbm %s1250_s1, 256 }
  0x33   : > { %p867_p12 = scmp.lt.s32.totalorder %s860_s28, %s1250_s1  ;;  %p868_p13 = scmp.lt.s32.totalorder %s866_s11, %s861_s20 }
  0x34   : > { %p864_p10 = pnand %p862_p2, %p833_p9 }
  0x35   : > { %p869_p0 = por %p868_p13, %p867_p12 }
  0x36   : > { %p865_p11 = pneg %p864_p10 }
  0x38   : > { %p870_p3 = pnand %p869_p0, %p865_p11 }
  0x3a   : > { %873 = shalt.err (!%p870_p3)
}
  0x3b   : > { %744 = dma.hbm_to_vmem [thread:$0]  (!%p1075_p7), %s211_s13, 512, %s213_s5, %s201_s7, %s1268_s10, %s1268_s10, %s1267_s30  }
  0x3c   : > { %224 = sbr.rel (%p1038_p8) target bundleno = 762 (0x2fa), region = 36  ;;  %s1119_s23 = sand.u32 (!%p1038_p8), 1, %s955_s16  }
  0x3d   : > { %s1122_s0 = sshll.u32 (!%p1038_p8), %s1119_s23, 5  ;;  %s227_s25 = scalar_lea.sflag (!%p1038_p8), [#allocation3], %s1119_s23 }
  0x3e   : > { %s230_s14 = scalar_lea.vmem (!%p1038_p8), [#allocation2], %s1122_s0 }
  0x41   : > { %934 = dma.done.wait (%p1025_p4), %s227_s25, 512  }
  0x42   : > { %936 = vsyncadd (%p1025_p4), %s227_s25, 4294966784  ;;  %s236_s26 = sand.u32 1, %s1016_s19   ;;  %s1132_s27 = scalar_lea.vmem [#allocation5], %s1122_s0 }
  0x43   : > { %s237_s5 = scalar_lea.sflag [#allocation6], %s236_s26 }
  0x44   : > { %938 = dma.done.wait (%p1025_p4), %s237_s5, 512  }
  0x45   : > { %940 = vsyncadd (%p1025_p4), %s237_s5, 4294966784 }
  0x46   : > { %942 = dma.done.wait (%p44_p1), [#allocation6], 2048  }
  0x47   : > { %944 = vsyncadd (%p44_p1), [#allocation6], 4294965248  ;;  %v280_v0 = vlaneseq  ;;  %vm299_vm0 = vcmask 261120   ;;  %v278_v5 = vld [vmem:[%s230_s14 + $0x10] sm:$0xff]  ;;  %v276_v6 = vld [vmem:[%s230_s14] sm:$0xff]  ;;  %s275_s30 = scalar_lea.vmem [#allocation8], %s1122_s0 }
  0x48   : > { %v279_v7 = vld [vmem:[%s230_s14 + $0x18] sm:$0xff]  ;;  %v293_v9 = vadd.f32 1.0, %v278_v5  ;;  %v291_v10 = vadd.f32 1.0, %v276_v6  ;;  %v277_v12 = vld [vmem:[%s230_s14 + $0x8] sm:$0xff]  ;;  %v440_v60 = vld [vmem:[%s1132_s27 + $0x10] sm:$0xff]  ;;  %s691_s10 = sshll.u32 %s1016_s19, 5 }
  0x49   : > { %v1142_v1 = vshrl.u32 %v280_v0, 7  ;;  %v1144_v2 = vand.u32 127, %v280_v0  ;;  %v294_v11 = vadd.f32 1.0, %v279_v7  ;;  %v292_v16 = vadd.f32 1.0, %v277_v12  ;;  %v441_v59 = vld [vmem:[%s1132_s27 + $0x18] sm:$0xff]  ;;  %v439_v61 = vld [vmem:[%s1132_s27 + $0x8] sm:$0xff]  ;;  %s548_s28 = scalar_lea.hbm %s1253_s4, %s691_s10 }
  0x4a   : > { %466 = vmatpush.msra.mxu2 %v441_v59  ;;  %s549_s20 = sshll.u32 %s275_s30, 4  ;;  %s551_s24 = sshll.u32 %s548_s28, 4  ;;  %s550_s20 = int_to_ptr.vmem [resolvable:$true] %s549_s20  ;;  %s552_s24 = int_to_ptr.hbm [resolvable:$true] %s551_s24 }
  0x4b   : > { %v1147_v3 = vadd.s32 16, %v1142_v1  ;;  %v1150_v4 = vadd.s32 24, %v1142_v1  ;;  %vm287_vm2 = vcmp.eq.s32.totalorder %v1142_v1, %v1144_v2  ;;  %v1159_v8 = vadd.s32 8, %v1142_v1  ;;  %s537_s6 = scalar_lea.sflag [#allocation4], %s1119_s23  ;;  %s903_s11 = sshra.s32 %s552_s24, 4  ;;  %s904_s11 = int_to_ptr.hbm [resolvable:$true] %s903_s11 }
  0x4c   : > { %v295_v14 = vsel %vm287_vm2, %v291_v10, %v276_v6  ;;  %467 = vmatpush.msra.mxu2 %v440_v60  ;;  %v495_v6 = vld [vmem:[#allocation7 + $0x60] sm:$0xff]  ;;  %v492_v10 = vld [vmem:[#allocation7 + $0x48] sm:$0xff]  ;;  %s905_s12 = scalar_lea.hbm %s904_s11, 32  ;;  %s909_s25 = scalar_lea.hbm %s1253_s4, 256 }
  0x4d   : > { %vm289_vm1 = vcmp.eq.s32.totalorder %v1147_v3, %v1144_v2  ;;  %vm290_vm3 = vcmp.eq.s32.totalorder %v1150_v4, %v1144_v2  ;;  %v300_v18 = vsel %vm299_vm0, %v295_v14, 0.0  ;;  %vm288_vm4 = vcmp.eq.s32.totalorder %v1159_v8, %v1144_v2  ;;  %v438_v2 = vld [vmem:[%s1132_s27] sm:$0xff]  ;;  %v498_v3 = vld [vmem:[#allocation7 + $0x78] sm:$0xff]  ;;  %v497_v4 = vld [vmem:[#allocation7 + $0x70] sm:$0xff]  ;;  %p906_p1 = scmp.ne.s32.totalorder %s904_s11, %s905_s12  ;;  %p910_p7 = scmp.lt.s32.totalorder %s904_s11, %s1253_s4 }
  0x4e   : > { %v297_v13 = vsel %vm289_vm1, %v293_v9, %v278_v5  ;;  %v298_v15 = vsel %vm290_vm3, %v294_v11, %v279_v7  ;;  %301 = vadd.xlane.f32.xlu0 %v300_v18  ;;  %v296_v19 = vsel %vm288_vm4, %v292_v16, %v277_v12  ;;  %468 = vmatpush.msra.mxu2 %v439_v61  ;;  %v496_v5 = vld [vmem:[#allocation7 + $0x68] sm:$0xff]  ;;  %v494_v7 = vld [vmem:[#allocation7 + $0x58] sm:$0xff]  ;;  %v493_v9 = vld [vmem:[#allocation7 + $0x50] sm:$0xff]  ;;  %p911_p9 = scmp.lt.s32.totalorder %s909_s25, %s905_s12 }
  0x4f   : > { %v306_v17 = vsel %vm299_vm0, %v297_v13, 0.0  ;;  %380 = vmatpush.msra.mxu0 %v298_v15  ;;  %v309_v20 = vsel %vm299_vm0, %v298_v15, 0.0  ;;  %v303_v21 = vsel %vm299_vm0, %v296_v19, 0.0  ;;  %693 = vmatpush.msra.mxu3 %v498_v3  ;;  %v491_v11 = vld [vmem:[#allocation7 + $0x40] sm:$0xff]  ;;  %v490_v12 = vld [vmem:[#allocation7 + $0x38] sm:$0xff]  ;;  %v488_v15 = vld [vmem:[#allocation7 + $0x28] sm:$0xff]  ;;  %p907_p4 = pnand %p906_p1, %p1064_p5 }
  0x50   : > { %307 = vadd.xlane.f32.xlu1 %v306_v17  ;;  %469 = vmatpush.msra.mxu2 %v438_v2  ;;  %v487_v16 = vld [vmem:[#allocation7 + $0x20] sm:$0xff]  ;;  %v486_v17 = vld [vmem:[#allocation7 + $0x18] sm:$0xff]  ;;  %p912_p2 = por %p911_p9, %p910_p7 }
  0x51   : > { %381 = vmatpush.msra.mxu0 %v297_v13  ;;  %695 = vmatpush.msra.mxu3 %v497_v4  ;;  %p908_p8 = pneg %p907_p4 }
  0x53   : > { %382 = vmatpush.msra.mxu0 %v296_v19  ;;  %697 = vmatpush.msra.mxu3 %v496_v5  ;;  %v485_v19 = vld [vmem:[#allocation7 + $0x10] sm:$0xff]  ;;  %p913_p10 = pnand %p912_p2, %p908_p8 }
  0x55   : > { %383 = vmatpush.msra.mxu0 %v295_v14  ;;  %699 = vmatpush.msra.mxu3 %v495_v6  ;;  %v489_v14 = vld [vmem:[#allocation7 + $0x30] sm:$0xff] }
  0x56   : > { %304 = vadd.xlane.f32.xlu0 %v303_v21 }
  0x57   : > { %503 = vmatpush.msrb.mxu0 %v498_v3  ;;  %701 = vmatpush.msra.mxu3 %v494_v7 }
  0x58   : > { %310 = vadd.xlane.f32.xlu1 %v309_v20  ;;  %v484_v20 = vld [vmem:[#allocation7 + $0x8] sm:$0xff] }
  0x59   : > { %504 = vmatpush.msrb.mxu0 %v497_v4  ;;  %703 = vmatpush.msra.mxu3 %v493_v9 }
  0x5b   : > { %505 = vmatpush.msrb.mxu0 %v496_v5  ;;  %705 = vmatpush.msra.mxu3 %v492_v10 }
  0x5d   : > { %506 = vmatpush.msrb.mxu0 %v495_v6  ;;  %707 = vmatpush.msra.mxu3 %v491_v11 }
  0x5f   : > { %507 = vmatpush.msrb.mxu0 %v494_v7  ;;  %709 = vmatpush.msra.mxu3 %v490_v12 }
  0x61   : > { %508 = vmatpush.msrb.mxu0 %v493_v9  ;;  %711 = vmatpush.msra.mxu3 %v489_v14 }
  0x63   : > { %509 = vmatpush.msrb.mxu0 %v492_v10  ;;  %713 = vmatpush.msra.mxu3 %v488_v15 }
  0x65   : > { %510 = vmatpush.msrb.mxu0 %v491_v11  ;;  %715 = vmatpush.msra.mxu3 %v487_v16 }
  0x67   : > { %511 = vmatpush.msrb.mxu0 %v490_v12  ;;  %717 = vmatpush.msra.mxu3 %v486_v17 }
  0x69   : > { %512 = vmatpush.msrb.mxu0 %v489_v14  ;;  %719 = vmatpush.msra.mxu3 %v485_v19 }
  0x6b   : > { %513 = vmatpush.msrb.mxu0 %v488_v15  ;;  %721 = vmatpush.msra.mxu3 %v484_v20 }
  0x6d   : > { %514 = vmatpush.msrb.mxu0 %v487_v16 }
  0x6f   : > { %515 = vmatpush.msrb.mxu0 %v486_v17 }
  0x71   : > { %516 = vmatpush.msrb.mxu0 %v485_v19 }
  0x73   : > { %517 = vmatpush.msrb.mxu0 %v484_v20 }
  0xc1   : > { %v302_v23 = vpop.xlane.xlu0 %301 }
  0xc2   : > { %vm318_vm6 = vweird.f32 %v302_v23 }
  0xc3   : > { %v308_v22 = vpop.xlane.xlu1 %307 }
  0xc4   : > { %791 = vrsqrt.f32 %v308_v22  ;;  %vm338_vm8 = vweird.f32 %v308_v22 }
  0xc5   : > { %793 = vrsqrt.f32 %v302_v23 }
  0xc9   : > { %v305_v28 = vpop.xlane.xlu0 %304 }
  0xca   : > { %v792_v24 = vpop.eup %791  ;;  %vm328_vm15 = vweird.f32 %v305_v28 }
  0xcb   : > { %v794_v25 = vpop.eup %793  ;;  %v333_v26 = vmul.f32 %v792_v24, %v308_v22  ;;  %v311_v27 = vpop.xlane.xlu1 %310  ;;  %vm339_vm9 = vweird.f32 %v792_v24  ;;  %v483_v22 = vld [vmem:[#allocation7] sm:$0xff] }
  0xcc   : > { %v313_v29 = vmul.f32 %v794_v25, %v302_v23  ;;  %795 = vrsqrt.f32 %v311_v27  ;;  %vm319_vm5 = vweird.f32 %v794_v25  ;;  %vm348_vm10 = vweird.f32 %v311_v27  ;;  %vm1183_vm12 = vmor %vm338_vm8, %vm339_vm9  ;;  %518 = vmatpush.msrb.mxu0 %v483_v22  ;;  %723 = vmatpush.msra.mxu3 %v483_v22 }
  0xcd   : > { %v334_v30 = vmul.f32 %v792_v24, %v333_v26  ;;  %797 = vrsqrt.f32 %v305_v28  ;;  %vm320_vm7 = vmor %vm318_vm6, %vm319_vm5 }
  0xce   : > { %v314_v31 = vmul.f32 %v794_v25, %v313_v29 }
  0xcf   : > { %v335_v33 = vmul.f32 0.5, %v334_v30 }
  0xd0   : > { %v315_v32 = vmul.f32 0.5, %v314_v31 }
  0xd1   : > { %v336_v40 = vsub.f32 1.5, %v335_v33 }
  0xd2   : > { %v796_v34 = vpop.eup %795  ;;  %v316_v35 = vsub.f32 1.5, %v315_v32 }
  0xd3   : > { %v798_v36 = vpop.eup %797  ;;  %v343_v37 = vmul.f32 %v796_v34, %v311_v27  ;;  %vm349_vm11 = vweird.f32 %v796_v34  ;;  %v337_v48 = vmul.f32 %v792_v24, %v336_v40  ;;  %v790_v27 = vld [vmem:[%s1252_s3] ss:$0 sm:$0xff] }
  0xd4   : > { %v323_v38 = vmul.f32 %v798_v36, %v305_v28  ;;  %v317_v39 = vmul.f32 %v794_v25, %v316_v35  ;;  %vm350_vm13 = vmor %vm348_vm10, %vm349_vm11  ;;  %vm329_vm14 = vweird.f32 %v798_v36 }
  0xd5   : > { %v344_v41 = vmul.f32 %v796_v34, %v343_v37  ;;  %vm330_vm5 = vmor %vm328_vm15, %vm329_vm14  ;;  %v341_v54 = vsel %vm1183_vm12, %v792_v24, %v337_v48 }
  0xd6   : > { %v324_v42 = vmul.f32 %v798_v36, %v323_v38  ;;  %v321_v43 = vsel %vm320_vm7, %v794_v25, %v317_v39  ;;  %v354_v58 = vsel %vm289_vm1, %v341_v54, inf }
  0xd7   : > { %v345_v44 = vmul.f32 0.5, %v344_v41  ;;  %v352_v45 = vsel %vm287_vm2, %v321_v43, inf }
  0xd8   : > { %v325_v46 = vmul.f32 0.5, %v324_v42  ;;  %672 = vmatmul.msk.f32.vlgmr.msra.gmra.mxu0 %vm299_vm0, %v352_v45 }
  0xd9   : > { %v346_v47 = vsub.f32 1.5, %v345_v44 }
  0xda   : > { %v326_v50 = vsub.f32 1.5, %v325_v46 }
  0xdb   : > { %v347_v51 = vmul.f32 %v796_v34, %v346_v47 }
  0xdc   : > { %v327_v52 = vmul.f32 %v798_v36, %v326_v50 }
  0xdd   : > { %v351_v53 = vsel %vm350_vm13, %v796_v34, %v347_v51 }
  0xde   : > { %v331_v55 = vsel %vm330_vm5, %v798_v36, %v327_v52  ;;  %v355_v56 = vsel %vm290_vm3, %v351_v53, inf }
  0xdf   : > { %v353_v57 = vsel %vm288_vm4, %v331_v55, inf  ;;  %421 = vmatpush.msra.mxu1 %v355_v56 }
  0xe0   : > { %673 = vmatmul.msk.f32.gmra.mxu0 %vm299_vm0, %v353_v57 }
  0xe1   : > { %422 = vmatpush.msra.mxu1 %v354_v58 }
  0xe3   : > { %423 = vmatpush.msra.mxu1 %v353_v57 }
  0xe5   : > { %424 = vmatpush.msra.mxu1 %v352_v45 }
  0xe7   : > { %692 = vmatpush.msrb.mxu1 %v498_v3 }
  0xe8   : > { %674 = vmatmul.msk.f32.gmra.mxu0 %vm299_vm0, %v354_v58 }
  0xe9   : > { %694 = vmatpush.msrb.mxu1 %v497_v4 }
  0xeb   : > { %696 = vmatpush.msrb.mxu1 %v496_v5 }
  0xed   : > { %698 = vmatpush.msrb.mxu1 %v495_v6 }
  0xef   : > { %700 = vmatpush.msrb.mxu1 %v494_v7 }
  0xf0   : > { %675 = vmatmul.msk.f32.gmra.mxu0 %vm299_vm0, %v355_v56 }
  0xf1   : > { %702 = vmatpush.msrb.mxu1 %v493_v9 }
  0xf3   : > { %704 = vmatpush.msrb.mxu1 %v492_v10 }
  0xf5   : > { %706 = vmatpush.msrb.mxu1 %v491_v11 }
  0xf7   : > { %708 = vmatpush.msrb.mxu1 %v490_v12 }
  0xf9   : > { %710 = vmatpush.msrb.mxu1 %v489_v14 }
  0xfb   : > { %712 = vmatpush.msrb.mxu1 %v488_v15 }
  0xfd   : > { %714 = vmatpush.msrb.mxu1 %v487_v16 }
  0xff   : > { %716 = vmatpush.msrb.mxu1 %v486_v17 }
 0x101   : > { %718 = vmatpush.msrb.mxu1 %v485_v19 }
 0x103   : > { %720 = vmatpush.msrb.mxu1 %v484_v20 }
 0x105   : > { %722 = vmatpush.msrb.mxu1 %v483_v22 }
 0x155   : > { %v385_v62 = vpop.f32.mrf.mxu0 }
 0x156   : > { %676 = vmatmul.msk.f32.vlgmr.msra.gmra.mxu1 %vm299_vm0, %v385_v62 }
 0x15d   : > { %v388_v63 = vpop.f32.mrf.mxu0 }
 0x15e   : > { %677 = vmatmul.msk.f32.gmra.mxu1 %vm299_vm0, %v388_v63 }
 0x165   : > { %v391_v0 = vpop.f32.mrf.mxu0 }
 0x166   : > { %678 = vmatmul.msk.f32.gmra.mxu1 %vm299_vm0, %v391_v0 }
 0x16d   : > { %v394_v1 = vpop.f32.mrf.mxu0 }
 0x16e   : > { %679 = vmatmul.msk.f32.gmra.mxu1 %vm299_vm0, %v394_v1 }
 0x1d3   : > { %v426_v8 = vpop.f32.mrf.mxu1 }
 0x1d4   : > { %680 = vmatmul.msk.f32.vlgmr.msra.gmra.mxu2 %vm299_vm0, %v426_v8 }
 0x1db   : > { %v429_v13 = vpop.f32.mrf.mxu1 }
 0x1dc   : > { %681 = vmatmul.msk.f32.gmra.mxu2 %vm299_vm0, %v429_v13 }
 0x1e3   : > { %v432_v18 = vpop.f32.mrf.mxu1 }
 0x1e4   : > { %682 = vmatmul.msk.f32.gmra.mxu2 %vm299_vm0, %v432_v18 }
 0x1eb   : > { %v435_v21 = vpop.f32.mrf.mxu1 }
 0x1ec   : > { %683 = vmatmul.msk.f32.gmra.mxu2 %vm299_vm0, %v435_v21 }
 0x257   : > { %v471_v23 = vpop.f32.mrf.mxu2 }
 0x258   : > { %519 = vmatmul.f32.vlgmr.msrb.gmra.mxu0 %v471_v23 }
 0x25f   : > { %v474_v24 = vpop.f32.mrf.mxu2 }
 0x260   : > { %522 = vmatmul.f32.vlgmr.msrb.gmra.mxu1 %v474_v24 }
 0x267   : > { %v477_v25 = vpop.f32.mrf.mxu2 }
 0x268   : > { %525 = vmatmul.f32.vlgmr.msra.gmra.mxu3 %v477_v25 }
 0x26f   : > { %v480_v26 = vpop.f32.mrf.mxu2 }
 0x270   : > { %528 = vmatmul.f32.gmra.mxu3 %v480_v26 }
 0x2d5   : > { %v520_v28 = vpop.f32.mrf.mxu0 }
 0x2d6   : > { %v521_v29 = vadd.f32 %v790_v27, %v520_v28 }
 0x2d8   : > { %532 = vst [vmem:[%s275_s30] sm:$0xff] %v521_v29 }
 0x2dd   : > { %v523_v30 = vpop.f32.mrf.mxu1 }
 0x2de   : > { %v524_v31 = vadd.f32 %v790_v27, %v523_v30 }
 0x2e0   : > { %533 = vst [vmem:[%s275_s30 + $0x8] sm:$0xff] %v524_v31 }
 0x2eb   : > { %v526_v32 = vpop.f32.mrf.mxu3 }
 0x2ec   : > { %v527_v33 = vadd.f32 %v790_v27, %v526_v32 }
 0x2ee   : > { %534 = vst [vmem:[%s275_s30 + $0x10] sm:$0xff] %v527_v33 }
 0x2f3   : > { %v529_v34 = vpop.f32.mrf.mxu3 }
 0x2f4   : > { %v530_v35 = vadd.f32 %v790_v27, %v529_v34 }
 0x2f6   : > { %535 = vst [vmem:[%s275_s30 + $0x18] sm:$0xff] %v530_v35 }
 0x2f7   : > { %916 = shalt.err (!%p913_p10)
}
 0x2f8   : > { %s968_s23 = smov 128   ;;  %s969_s5 = smov 8  }
 0x2f9   : > { %732 = dma.vmem_to_hbm [thread:$0]  (%p1064_p5), %s550_s20, 512, %s552_s24, %s537_s6, %s968_s23, %s968_s23, %s969_s5  }
 0x2fa PF: > { %p752_p11 = scmp.ge.s32.totalorder %s963_s18, 2  ;;  %s566_s27 = sand.u32 1, %s951_s15  }
 0x2fb   : > { %s567_s21 = scalar_lea.sflag [#allocation4], %s566_s27 }
 0x2fc   : > { %p746_p12 = pnand %p752_p11, %p1030_p6 }
 0x2fe   : > { %p747_p13 = pneg %p746_p12 }
 0x300   : > { %946 = dma.done.wait (%p747_p13), %s567_s21, 512  }
 0x301   : > { %948 = vsyncadd (%p747_p13), %s567_s21, 4294966784  ;;  %p20_p0 = scmp.ge.s32.totalorder %s1047_s29, 10   ;;  %s1271_s15 = smov %s955_s16 }
 0x302   : > { %s1272_s16 = smov %s959_s17  ;;  %s1273_s17 = smov %s1060_s8 }
 0x303   : > { %s1274_s18 = smov %s1047_s29  ;;  %22 = sbr.rel (!%p20_p0) target bundleno = 10 (0xa), region = 98 }
 0x308   :  { %573 = vsyncpa [#allocation3], 1 }
 0x309   :  { %575 = vsyncpa [#allocation3 + $0x1], 1 }
 0x30a   :  { %576 = vsyncpa [#allocation6], 1 }
 0x30b   :  { %578 = vsyncpa [#allocation6 + $0x1], 1 }
 0x30c   :  { %579 = vsyncpa [#allocation4], 1 }
 0x30d   :  { %581 = vsyncpa [#allocation4 + $0x1], 1 }

</bundles_post_ra>
